<compile_context>
chip_gen: v7x
topology: tpu7x:2x2x1
jax: 0.10.0
libtpu: 0.0.40
codegen_flags: <defaults>
</compile_context>

<pallas_src>
import functools

import jax
import jax.numpy as jnp
from jax import lax
from jax.experimental import pallas as pl
from jax.experimental.pallas import tpu as pltpu

_MIB = 1024 * 1024
_HALF_DTYPES = (jnp.dtype(jnp.bfloat16), jnp.dtype(jnp.float16))


def _round_up(x, m):
    return ((x + m - 1) // m) * m


def _sublane_pack(dtype):
    # sublane packing factor: 8 for 32-bit, 16 for 16-bit, 32 for 8-bit dtypes
    itemsize = jnp.dtype(dtype).itemsize
    return max(8, 32 // max(itemsize, 1))


def _tpu_hw():
    """Best-effort (vmem_bytes_per_core, tensorcores_per_chip)."""
    vmem = None
    cores = 1
    kind = ""
    try:
        kind = jax.devices()[0].device_kind.lower()
    except Exception:
        pass
    if "v7" in kind or "7x" in kind:
        cores = 2
        vmem = 64 * _MIB          # per-TensorCore on v7x
    elif ("v6" in kind) or ("v5" in kind) or ("v4" in kind):
        vmem = 128 * _MIB
    elif ("v3" in kind) or ("v2" in kind):
        vmem = 16 * _MIB
    if vmem is None:
        try:
            vmem = int(pltpu.get_tpu_info().vmem_capacity_bytes)
        except Exception:
            vmem = 64 * _MIB      # conservative default
    return vmem, cores


def _pick_chunk(h, forced):
    """Lane-chunk for the two-pass path (must divide h, multiple of 128)."""
    if forced is not None and forced < h and h % forced == 0 and forced % 128 == 0:
        return forced
    if h >= 1024:
        for c in (512, 256, 128):
            if h % c == 0:
                return c
    return h  # single-pass


def _rmsnorm_kernel(x_ref, w_ref, o_ref, *, eps, inv_h, chunk, n_chunks, half_weight):
    # x_ref: (tm, H) tile of rows; w_ref: (1, H) weight resident in VMEM;
    # o_ref: (tm, H) output tile.
    tm = x_ref.shape[0]

    if n_chunks == 1:
        x = x_ref[...].astype(jnp.float32)
        ssq = jnp.sum(x * x, axis=-1, keepdims=True)          # XLU reduce
        inv_rms = lax.rsqrt(ssq * inv_h + eps)                 # EUP rsqrt
        xn = x * inv_rms
        w = w_ref[...]
        if half_weight:
            xn = xn.astype(w.dtype)
        o_ref[...] = (w * xn).astype(o_ref.dtype)
        return

    # Two-pass H-chunked path: keeps the live f32 working set at tm*chunk
    # instead of tm*H.  Re-reading x from VMEM is free (HBM-bound kernel).
    def ssq_body(c, acc):
        start = pl.multiple_of(c * chunk, 128)
        xc = x_ref[:, pl.ds(start, chunk)].astype(jnp.float32)
        return acc + jnp.sum(xc * xc, axis=-1, keepdims=True)

    ssq = lax.fori_loop(0, n_chunks, ssq_body,
                        jnp.zeros((tm, 1), jnp.float32))
    inv_rms = lax.rsqrt(ssq * inv_h + eps)

    @pl.loop(0, n_chunks)
    def _(c):
        start = pl.multiple_of(c * chunk, 128)
        xc = x_ref[:, pl.ds(start, chunk)].astype(jnp.float32) * inv_rms
        wc = w_ref[:, pl.ds(start, chunk)]
        if half_weight:
            xc = xc.astype(wc.dtype)
        o_ref[:, pl.ds(start, chunk)] = (wc * xc).astype(o_ref.dtype)


def mixed_fused_rms_norm(x, weight, eps=1e-5, *, _force_h_chunk=None):
    """RMSNorm over the last dimension of x with per-element weight.

    x:      [..., H]   (any float dtype)
    weight: [H]
    """
    orig_shape = x.shape
    H = orig_shape[-1]
    assert weight.shape == (H,), "normalized_shape must be the last dim of x"

    w_dtype = jnp.dtype(weight.dtype)
    half_weight = w_dtype in _HALF_DTYPES
    out_dtype = w_dtype if half_weight else jnp.promote_types(jnp.float32, w_dtype)

    x2d = x.reshape(-1, H)
    R = x2d.shape[0]
    w2d = weight.reshape(1, H)

    # Lane-dense padding: only when H is not a multiple of 128 AND the extra
    # traffic is small.  Variance uses 1/true_H, so zero padding is exact.
    H_used = H
    pad = 0
    if H % 128 != 0:
        h_pad = _round_up(H, 128)
        if h_pad <= int(H * 1.25):
            pad = h_pad - H
            H_used = h_pad
            x2d = jnp.pad(x2d, ((0, 0), (0, pad)))
            w2d = jnp.pad(w2d, ((0, 0), (0, pad)))

    chunk = _pick_chunk(H_used, _force_h_chunk)
    n_chunks = H_used // chunk

    in_bytes = jnp.dtype(x.dtype).itemsize
    out_bytes = jnp.dtype(out_dtype).itemsize
    w_bytes = H_used * w_dtype.itemsize

    pack = max(_sublane_pack(x.dtype), _sublane_pack(out_dtype))
    vmem_cap, cores = _tpu_hw()

    # Scoped-VMEM ceiling per generation: ~52 MiB of v7x's 64 MiB/TC,
    # ~104 MiB of a 128-MiB part.
    limit_cap = max(min(vmem_cap - 12 * _MIB, int(vmem_cap * 0.82)), 8 * _MIB)

    # Per-row VMEM cost: double-buffered in/out streams + live f32 working set
    # (bounded by the chunk in the two-pass path; full H in single-pass).
    f32_row = 4 * (2 * chunk if n_chunks > 1 else H_used)
    bytes_per_row = 2 * H_used * (in_bytes + out_bytes) + f32_row

    budget = max(limit_cap - 8 * _MIB - w_bytes, 2 * _MIB)
    tm_vmem = budget // bytes_per_row
    # Cap streamed bytes per step (~16 MiB in+out) so the ~0.35 us fixed cost
    # per grid step stays negligible without starving VMEM; cap rows at 4096.
    tm_step = (16 * _MIB) // max(H_used * (in_bytes + out_bytes), 1)
    tm = min(tm_vmem, tm_step, 4096, _round_up(R, pack))
    tm = max((tm // pack) * pack, pack)

    # Balance the grid across TensorCores (v7x: 2 TCs).  On single-TC chips
    # keep the tallest tile (no artificial split).
    if cores > 1 and R > cores * pack:
        steps = _round_up(max(pl.cdiv(R, tm), cores), cores)
        tm = min(tm, max(_round_up(pl.cdiv(R, steps), pack), pack))

    grid = (pl.cdiv(R, tm),)

    # Explicit scoped-VMEM limit including the f32 working set (weight is not
    # double-buffered: counted once).
    needed = (2 * tm * H_used * (in_bytes + out_bytes)
              + tm * f32_row
              + w_bytes + _MIB)
    vmem_limit = int(min(limit_cap, max(needed * 1.25 + _MIB, 16 * _MIB)))

    kernel = functools.partial(
        _rmsnorm_kernel, eps=float(eps), inv_h=1.0 / float(H),
        chunk=chunk, n_chunks=n_chunks, half_weight=half_weight)

    cost = pl.CostEstimate(
        flops=3 * R * H,
        transcendentals=R,
        bytes_accessed=R * H * (in_bytes + out_bytes) + H * w_dtype.itemsize)

    out2d = pl.pallas_call(
        kernel,
        out_shape=jax.ShapeDtypeStruct((R, H_used), out_dtype),
        grid_spec=pltpu.PrefetchScalarGridSpec(
            num_scalar_prefetch=0,
            grid=grid,
            in_specs=[
                pl.BlockSpec((tm, H_used), lambda i: (i, 0)),
                # weight: whole (1, H) array resident in VMEM, no per-step DMA
                pl.BlockSpec(memory_space=pltpu.MemorySpace.VMEM),
            ],
            out_specs=pl.BlockSpec((tm, H_used), lambda i: (i, 0)),
        ),
        compiler_params=pltpu.CompilerParams(
            dimension_semantics=("parallel",),
            vmem_limit_bytes=vmem_limit,
        ),
        cost_estimate=cost,
    )(x2d, w2d)

    if pad:
        out2d = out2d[:, :H]
    return out2d.reshape(orig_shape)


def manual_rms_norm_ref(x, weight, eps):
    # pure-JAX reference mirroring the PyTorch manual_rms_norm
    xf = x.astype(jnp.float32)
    var = jnp.mean(xf * xf, axis=-1, keepdims=True)
    xn = xf * lax.rsqrt(var + eps)
    if jnp.dtype(weight.dtype) in _HALF_DTYPES:
        xn = xn.astype(weight.dtype)
    return weight * xn


if __name__ == "__main__":
    key = jax.random.PRNGKey(0)
    batch, seq, hidden = 2, 8, 32
    eps = 1e-5

    # float32 path (MixedFusedRMSNorm Parameter init: ones)
    x = jax.random.normal(key, (batch, seq, hidden), dtype=jnp.float32)
    weight = jnp.ones((hidden,), dtype=jnp.float32)
    out = jax.block_until_ready(mixed_fused_rms_norm(x, weight, eps))
    ref = manual_rms_norm_ref(x, weight, eps)
    assert out.shape == x.shape
    assert out.dtype == ref.dtype
    assert jnp.allclose(out, ref, atol=1e-5, rtol=1e-5)

    # bf16 activations + bf16 weight, ragged row count (masked boundary tile
    # + half-precision output path).
    xb = jax.random.normal(jax.random.PRNGKey(1), (3, 5, hidden), dtype=jnp.bfloat16)
    wb = jnp.ones((hidden,), dtype=jnp.bfloat16)
    outb = jax.block_until_ready(mixed_fused_rms_norm(xb, wb, eps))
    refb = manual_rms_norm_ref(xb, wb, eps)
    assert outb.shape == xb.shape
    assert outb.dtype == jnp.bfloat16
    assert jnp.allclose(outb.astype(jnp.float32), refb.astype(jnp.float32),
                        atol=2e-2, rtol=2e-2)

    # Exercise the two-pass H-chunked path with a small shape by forcing a
    # 128-lane chunk (production would use it for H >= 1024).
    xc = jax.random.normal(jax.random.PRNGKey(2), (2, 4, 256), dtype=jnp.bfloat16)
    wc = (1.0 + 0.01 * jnp.arange(256, dtype=jnp.float32)).astype(jnp.bfloat16)
    outc = jax.block_until_ready(
        mixed_fused_rms_norm(xc, wc, eps, _force_h_chunk=128))
    refc = manual_rms_norm_ref(xc, wc, eps)
    assert outc.shape == xc.shape
    assert outc.dtype == jnp.bfloat16
    assert jnp.allclose(outc.astype(jnp.float32), refc.astype(jnp.float32),
                        atol=2e-2, rtol=2e-2)

    print("KERNEL_OK")
</pallas_src>

<mosaic_0001>
module attributes {stable_mosaic.version = 11 : i64} {
  func.func @_rmsnorm_kernel(%arg0: i32, %arg1: memref<16x32xf32, #tpu.memory_space<vmem>>, %arg2: memref<1x32xf32, #tpu.memory_space<vmem>>, %arg3: memref<16x32xf32, #tpu.memory_space<vmem>>) attributes {dimension_semantics = [#tpu.dimension_semantics<parallel>], iteration_bounds = array<i64: 1>, scalar_prefetch = 0 : i64, scratch_operands = 0 : i64, tpu.core_type = #tpu.core_type<tc>, window_params = [{transform_indices = @transform_0, window_bounds = array<i64: 16, 32>}, {pipeline_mode = #tpu.pipeline_mode<synchronous>, transform_indices = @transform_1, window_bounds = array<i64: 1, 32>}, {transform_indices = @transform_2, window_bounds = array<i64: 16, 32>}]} {
    %c0 = arith.constant 0 : index
    %c0_0 = arith.constant 0 : index
    %0 = vector.load %arg1[%c0, %c0_0] : memref<16x32xf32, #tpu.memory_space<vmem>>, vector<16x32xf32>
    %1 = arith.mulf %0, %0 : vector<16x32xf32>
    %cst = arith.constant dense<0.000000e+00> : vector<16xf32>
    %2 = vector.multi_reduction <add>, %1, %cst [1] : vector<16x32xf32> to vector<16xf32>
    %3 = vector.shape_cast %2 : vector<16xf32> to vector<16x1xf32>
    %cst_1 = arith.constant 3.125000e-02 : f32
    %4 = vector.broadcast %cst_1 : f32 to vector<16x1xf32>
    %5 = arith.mulf %3, %4 : vector<16x1xf32>
    %cst_2 = arith.constant 9.99999974E-6 : f32
    %6 = vector.broadcast %cst_2 : f32 to vector<16x1xf32>
    %7 = arith.addf %5, %6 : vector<16x1xf32>
    %8 = math.rsqrt %7 : vector<16x1xf32>
    %9 = vector.broadcast %8 : vector<16x1xf32> to vector<16x32xf32>
    %10 = arith.mulf %0, %9 : vector<16x32xf32>
    %c0_3 = arith.constant 0 : index
    %c0_4 = arith.constant 0 : index
    %11 = vector.load %arg2[%c0_3, %c0_4] : memref<1x32xf32, #tpu.memory_space<vmem>>, vector<1x32xf32>
    %12 = vector.broadcast %11 : vector<1x32xf32> to vector<16x32xf32>
    %13 = arith.mulf %12, %10 : vector<16x32xf32>
    %c0_5 = arith.constant 0 : index
    %c0_6 = arith.constant 0 : index
    %14 = vector.load %arg3[%c0_5, %c0_6] : memref<16x32xf32, #tpu.memory_space<vmem>>, vector<16x32xf32>
    tpu.vector_store %arg3[%c0_5, %c0_6], %13 {strides = array<i32>} : memref<16x32xf32, #tpu.memory_space<vmem>>, vector<16x32xf32>,
    return
  }
  func.func @transform_0(%arg0: i32) -> (i32, i32) {
    %c0_i32 = arith.constant 0 : i32
    %c0_i32_0 = arith.constant 0 : i32
    return %arg0, %c0_i32 : i32, i32
  }
  func.func @transform_1(%arg0: i32) -> (i32, i32) {
    %c0_i32 = arith.constant 0 : i32
    %c0_i32_0 = arith.constant 0 : i32
    %c0_i32_1 = arith.constant 0 : i32
    return %c0_i32, %c0_i32_0 : i32, i32
  }
  func.func @transform_2(%arg0: i32) -> (i32, i32) {
    %c0_i32 = arith.constant 0 : i32
    %c0_i32_0 = arith.constant 0 : i32
    return %arg0, %c0_i32 : i32, i32
  }
}

</mosaic_0001>

<bundles_post_ra>
// kernel: tpu_custom_call.1
= control target key start
LH: loop header
LB: loop body
LE: loop exit
PB: predicated region body
PF: predicated region fallthrough
CT: control target
= control target key end

     0   :  { %7 = vsyncpa [#allocation3], 0  ;;  %s186_s0 = inlined_call_operand.hbm [shape: f32[16,32], index: 0, kind: input, shape index: {}]   ;;  %s187_s1 = inlined_call_operand.vmem [shape: f32[1,32], index: 1, kind: input, shape index: {}]   ;;  %s188_s2 = inlined_call_operand.hbm [shape: f32[16,32], index: 2, kind: output, shape index: {}]  }
   0x1   :  { %8 = vsyncpa [#allocation4], 0  ;;  %s130_s9 = smov [#allocation2]   ;;  %s82_s13 = scalar_lea.hbm %s186_s0, 256 }
   0x2   :  { %s14_s10 = sshll.u32 %s130_s9, 4  ;;  %p83_p0 = scmp.ne.s32.totalorder %s186_s0, %s82_s13  ;;  %s15_s10 = int_to_ptr.vmem [resolvable:$true] %s14_s10 }
   0x3   :  { %p86_p1 = scmp.lt.u32.totalorder %s82_s13, %s186_s0 }
   0x5   :  { %p88_p2 = pnand %p86_p1, %p83_p0 }
   0x7   :  { %91 = shalt.err (!%p88_p2)
}
   0x8   :  { %s92_s18 = scalar_lea.vmem %s15_s10, 256  ;;  %p97_p4 = scmp.lt.s32.totalorder %s15_s10, %s15_s10 }
   0x9   :  { %p93_p3 = scmp.ne.s32.totalorder %s15_s10, %s92_s18  ;;  %p98_p5 = scmp.lt.s32.totalorder %s92_s18, %s92_s18 }
   0xb   :  { %p99_p6 = por %p98_p5, %p97_p4 }
   0xd   :  { %p100_p7 = pnand %p99_p6, %p93_p3 }
   0xf   :  { %103 = shalt.err (!%p100_p7)
}
  0x10   :  { %s131_s19 = smov 128   ;;  %s132_s20 = smov 8  }
  0x11   :  { %20 = dma.hbm_to_vmem [thread:$0]  %s186_s0, 256, %s15_s10, [#allocation3], %s131_s19, %s131_s19, %s132_s20  }
  0x12   :  { %126 = dma.done.wait [#allocation3], 256  }
  0x13   :  { %127 = vsyncadd [#allocation3], 4294967040  ;;  %v26_v0 = vld [vmem:[#allocation2] sm:$0xff]  ;;  %vm30_vm0 = vcmask 261120   ;;  %v27_v1 = vld [vmem:[#allocation2 + $0x8] sm:$0xff]  ;;  %s133_s24 = smov [#allocation5]  }
  0x14   :  { %v28_v2 = vmul.f32 %v26_v0, %v26_v0  ;;  %v29_v3 = vmul.f32 %v27_v1, %v27_v1  ;;  %v73_v13 = vld [vmem:[%s187_s1] ss:$0 sm:$0xff]  ;;  %s61_s25 = sshll.u32 %s133_s24, 4  ;;  %s62_s25 = int_to_ptr.vmem [resolvable:$true] %s61_s25 }
  0x15   :  { %s104_s26 = scalar_lea.vmem %s62_s25, 256  ;;  %p109_p9 = scmp.lt.s32.totalorder %s62_s25, %s62_s25 }
  0x16   :  { %v31_v4 = vsel %vm30_vm0, %v28_v2, 0.0  ;;  %v34_v5 = vsel %vm30_vm0, %v29_v3, 0.0  ;;  %p105_p8 = scmp.ne.s32.totalorder %s62_s25, %s104_s26  ;;  %p110_p10 = scmp.lt.s32.totalorder %s104_s26, %s104_s26 }
  0x17   :  { %32 = vadd.xlane.f32.xlu0 %v31_v4 }
  0x18   :  { %p111_p11 = por %p110_p10, %p109_p9 }
  0x1a   :  { %p112_p12 = pnand %p111_p11, %p105_p8 }
  0x1b   :  { %35 = vadd.xlane.f32.xlu0 %v34_v5 }
  0xa4   :  { %v33_v6 = vpop.xlane.xlu0 %32 }
  0xa5   :  { %v37_v7 = vmul.f32 0.03125, %v33_v6 }
  0xa7   :  { %v39_v8 = vadd.f32 1e-05, %v37_v7 }
  0xa8   :  { %v36_v9 = vpop.xlane.xlu0 %35 }
  0xa9   :  { %78 = vrsqrt.f32 %v39_v8  ;;  %v38_v10 = vmul.f32 0.03125, %v36_v9 }
  0xab   :  { %v40_v11 = vadd.f32 1e-05, %v38_v10 }
  0xad   :  { %80 = vrsqrt.f32 %v40_v11 }
  0xb3   :  { %v79_v12 = vpop.eup %78 }
  0xb4   :  { %v43_v14 = vmul.f32 %v79_v12, %v26_v0 }
  0xb6   :  { %v52_v15 = vmul.f32 %v73_v13, %v43_v14 }
  0xb7   :  { %v81_v16 = vpop.eup %80 }
  0xb8   :  { %v44_v17 = vmul.f32 %v81_v16, %v27_v1  ;;  %54 = vst.msk [vmem:[#allocation5] sm:$0xff] %vm30_vm0, %v52_v15 }
  0xba   :  { %v53_v18 = vmul.f32 %v73_v13, %v44_v17 }
  0xbc   :  { %55 = vst.msk [vmem:[#allocation5 + $0x8] sm:$0xff] %vm30_vm0, %v53_v18 }
  0xbd   :  { %115 = shalt.err (!%p112_p12)
}
  0xbe   :  { %s116_s28 = scalar_lea.hbm %s188_s2, 256 }
  0xbf   :  { %p117_p13 = scmp.ne.s32.totalorder %s188_s2, %s116_s28  ;;  %p120_p0 = scmp.lt.u32.totalorder %s116_s28, %s188_s2 }
  0xc1   :  { %p122_p1 = pnand %p120_p0, %p117_p13 }
  0xc3   :  { %125 = shalt.err (!%p122_p1)
}
  0xc4   :  { %67 = dma.vmem_to_hbm [thread:$0]  %s62_s25, 256, %s188_s2, [#allocation4], %s131_s19, %s131_s19, %s132_s20  }
  0xc5   :  { %128 = dma.done.wait [#allocation4], 256  }
  0xc6   :  { %129 = vsyncadd [#allocation4], 4294967040 }
  0xc7   :  { %71 = vsyncpa [#allocation3], 1 }
  0xc8   :  { %72 = vsyncpa [#allocation4], 1 }

</bundles_post_ra>
